<compile_context>
chip_gen: v5e
topology: v5e:2x2
jax: 0.10.0
libtpu: 0.0.40
codegen_flags: <defaults>
</compile_context>

<pallas_src>
import functools

import jax
import jax.numpy as jnp
from jax.experimental import pallas as pl
from jax.experimental.pallas import tpu as pltpu


_TARGET_BLOCK_BYTES = 2 * 1024 * 1024  # ~2 MiB streaming keys block


def _scorer_kernel(q_ref, k_ref, o_ref, *, precision):
    # q_ref: (TB, 1, N)   — query rows for this batch tile
    # k_ref: (TB, TS, N)  — one (batch, seq) tile of keys
    # o_ref: (TB, 1, TS)  — scores for this (batch, seq) tile
    q = q_ref[...]
    k = k_ref[...]
    if k.dtype != q.dtype:
        # Cast only the streamed tile (hidden under the DMA); avoids a
        # wrapper-side astype that would rewrite all of keys in HBM.
        k = k.astype(q.dtype)
    scores = jnp.einsum(
        "bqn,bsn->bqs", q, k,
        preferred_element_type=jnp.float32,   # f32 accumulation on the MXU
        precision=precision,
    )  # (TB, 1, TS), lane-dense along TS
    o_ref[...] = scores.astype(o_ref.dtype)


def scorer(query: jax.Array, keys: jax.Array) -> jax.Array:
    """Dot-product attention scores.

    query: (B, N) float
    keys:  (B, S, N) float
    returns scores: (B, S) in the promoted input dtype
    """
    B, N = query.shape
    Bk, S, M = keys.shape
    assert B == Bk and N == M, "dot-product scorer requires n == m"

    out_dtype = jnp.result_type(query.dtype, keys.dtype)
    # Only the tiny (B, N) query is cast in the wrapper; keys stay untouched.
    query = query.astype(out_dtype)

    k_itemsize = jnp.dtype(keys.dtype).itemsize
    o_itemsize = jnp.dtype(out_dtype).itemsize
    row_bytes = N * k_itemsize

    # ---- adaptive seq tile: ~2 MiB keys block, multiple of 128, or full S.
    if S * row_bytes <= _TARGET_BLOCK_BYTES:
        TS = S
    else:
        TS = max(128, (_TARGET_BLOCK_BYTES // row_bytes) // 128 * 128)
        if TS >= S:
            TS = S

    # ---- adaptive batch tile: only when the whole seq fits in one tile.
    if TS == S:
        per_row_bytes = S * row_bytes
        TB = max(1, min(B, _TARGET_BLOCK_BYTES // max(per_row_bytes, 1)))
        if B >= 2:
            TB = min(TB, -(-B // 2))  # keep >= 2 grid steps for 2-TC chips
    else:
        TB = 1

    grid = (pl.cdiv(B, TB), pl.cdiv(S, TS))

    # ---- VMEM budget: double-buffered blocks + headroom, capped for v7x.
    keys_block = TB * TS * N * k_itemsize
    q_block = TB * N * o_itemsize
    out_block = TB * TS * o_itemsize
    footprint = 2 * (keys_block + q_block + out_block)
    vmem_limit = int(min(max(2 * footprint, 32 * 1024 * 1024),
                         64 * 1024 * 1024))

    precision = (jax.lax.Precision.HIGHEST if out_dtype == jnp.float32
                 else jax.lax.Precision.DEFAULT)

    cost = pl.CostEstimate(
        flops=2 * B * S * N,
        transcendentals=0,
        bytes_accessed=(B * S * N * k_itemsize
                        + B * N * o_itemsize
                        + B * S * o_itemsize),
    )

    # Present query / output with a size-1 middle axis so every block's last
    # two dims are either full-extent or (8,128)-aligned.
    q3 = query.reshape(B, 1, N)

    out = pl.pallas_call(
        functools.partial(_scorer_kernel, precision=precision),
        out_shape=jax.ShapeDtypeStruct((B, 1, S), out_dtype),
        grid=grid,
        in_specs=[
            # query rows for this batch tile, constant across seq tiles
            pl.BlockSpec((TB, 1, N), lambda b, s: (b, 0, 0)),
            # streaming keys tile (double-buffered by auto-pipelining)
            pl.BlockSpec((TB, TS, N), lambda b, s: (b, s, 0)),
        ],
        out_specs=pl.BlockSpec((TB, 1, TS), lambda b, s: (b, 0, s)),
        compiler_params=pltpu.CompilerParams(
            dimension_semantics=("parallel", "parallel"),
            vmem_limit_bytes=vmem_limit,
        ),
        cost_estimate=cost,
    )(q3, keys)
    return out.reshape(B, S)


if __name__ == "__main__":
    key = jax.random.PRNGKey(0)
    kq, kk = jax.random.split(key)

    # Small shapes consistent with the module contract.
    B, S, N = 2, 8, 32
    query = jax.random.normal(kq, (B, N), dtype=jnp.float32)
    keys = jax.random.normal(kk, (B, S, N), dtype=jnp.float32)

    scores = scorer(query, keys)
    jax.block_until_ready(scores)

    ref = jnp.einsum("bn,bsn->bs", query, keys)
    assert scores.shape == (B, S)
    assert scores.dtype == jnp.float32
    assert jnp.allclose(scores, ref, atol=1e-4, rtol=1e-4)

    # Second small config: exercises batch tiling (TB=2) and a ragged batch.
    kq2, kk2 = jax.random.split(kk)
    B2, S2, N2 = 3, 300, 64
    q2 = jax.random.normal(kq2, (B2, N2), dtype=jnp.float32)
    k2 = jax.random.normal(kk2, (B2, S2, N2), dtype=jnp.float32)
    s2 = scorer(q2, k2)
    jax.block_until_ready(s2)
    ref2 = jnp.einsum("bn,bsn->bs", q2, k2)
    assert s2.shape == (B2, S2)
    assert jnp.allclose(s2, ref2, atol=1e-4, rtol=1e-4)

    print("KERNEL_OK")
</pallas_src>

<mosaic_0001>
module attributes {stable_mosaic.version = 11 : i64} {
  func.func @_scorer_kernel(%arg0: i32, %arg1: i32, %arg2: memref<1x1x32xf32, #tpu.memory_space<vmem>>, %arg3: memref<1x8x32xf32, #tpu.memory_space<vmem>>, %arg4: memref<1x1x8xf32, #tpu.memory_space<vmem>>) attributes {dimension_semantics = [#tpu.dimension_semantics<parallel>, #tpu.dimension_semantics<parallel>], iteration_bounds = array<i64: 2, 1>, scalar_prefetch = 0 : i64, scratch_operands = 0 : i64, tpu.core_type = #tpu.core_type<tc>, window_params = [{transform_indices = @transform_0, window_bounds = array<i64: 1, 1, 32>}, {transform_indices = @transform_1, window_bounds = array<i64: 1, 8, 32>}, {transform_indices = @transform_2, window_bounds = array<i64: 1, 1, 8>}]} {
    %c0 = arith.constant 0 : index
    %c0_0 = arith.constant 0 : index
    %c0_1 = arith.constant 0 : index
    %0 = vector.load %arg2[%c0, %c0_0, %c0_1] : memref<1x1x32xf32, #tpu.memory_space<vmem>>, vector<1x1x32xf32>
    %c0_2 = arith.constant 0 : index
    %c0_3 = arith.constant 0 : index
    %c0_4 = arith.constant 0 : index
    %1 = vector.load %arg3[%c0_2, %c0_3, %c0_4] : memref<1x8x32xf32, #tpu.memory_space<vmem>>, vector<1x8x32xf32>
    "tpu.trace_start"() <{level = 10 : i32, message = "bqn,bsn->bqs"}> : () -> ()
    %cst = arith.constant dense<0.000000e+00> : vector<1x1x8xf32>
    %2 = tpu.matmul %0, %1, %cst {dimension_numbers = #tpu.dot_dimension_numbers<[2], [2], [1], [1], [0, 0, 0, 1, 1, 1], [0], [0]>, precision = #tpu.contract_precision<fp32>} : vector<1x1x32xf32>, vector<1x8x32xf32>, vector<1x1x8xf32> -> vector<1x1x8xf32>
    "tpu.trace_stop"() : () -> ()
    %c0_5 = arith.constant 0 : index
    %c0_6 = arith.constant 0 : index
    %c0_7 = arith.constant 0 : index
    %3 = vector.load %arg4[%c0_5, %c0_6, %c0_7] : memref<1x1x8xf32, #tpu.memory_space<vmem>>, vector<1x1x8xf32>
    tpu.vector_store %arg4[%c0_5, %c0_6, %c0_7], %2 {strides = array<i32>} : memref<1x1x8xf32, #tpu.memory_space<vmem>>, vector<1x1x8xf32>,
    return
  }
  func.func @transform_0(%arg0: i32, %arg1: i32) -> (i32, i32, i32) {
    %c0_i32 = arith.constant 0 : i32
    %c0_i32_0 = arith.constant 0 : i32
    %c0_i32_1 = arith.constant 0 : i32
    return %arg0, %c0_i32, %c0_i32_0 : i32, i32, i32
  }
  func.func @transform_1(%arg0: i32, %arg1: i32) -> (i32, i32, i32) {
    %c0_i32 = arith.constant 0 : i32
    %c0_i32_0 = arith.constant 0 : i32
    return %arg0, %arg1, %c0_i32 : i32, i32, i32
  }
  func.func @transform_2(%arg0: i32, %arg1: i32) -> (i32, i32, i32) {
    %c0_i32 = arith.constant 0 : i32
    %c0_i32_0 = arith.constant 0 : i32
    return %arg0, %c0_i32, %arg1 : i32, i32, i32
  }
}

</mosaic_0001>

<bundles_post_ra>
// kernel: tpu_custom_call.1
= control target key start
LH: loop header
LB: loop body
LE: loop exit
PB: predicated region body
PF: predicated region fallthrough
CT: control target
= control target key end

     0   :  { %7 = vsyncpa [#allocation3], 0  ;;  %s857_s0 = inlined_call_operand.hbm [shape: f32[2,1,32], index: 0, kind: input, shape index: {}]   ;;  %s858_s1 = inlined_call_operand.hbm [shape: f32[2,8,32], index: 1, kind: input, shape index: {}]   ;;  %s859_s2 = inlined_call_operand.hbm [shape: f32[2,1,8], index: 2, kind: output, shape index: {}]  }
   0x1   :  { %9 = vsyncpa [#allocation3 + $0x1], 0 }
   0x2   :  { %10 = vsyncpa [#allocation6], 0 }
   0x3   :  { %12 = vsyncpa [#allocation6 + $0x1], 0 }
   0x4   :  { %13 = vsyncpa [#allocation4], 0 }
   0x5   :  { %15 = vsyncpa [#allocation4 + $0x1], 0  ;;  %s718_s9 = smov 0   ;;  %s720_s10 = smov 0  }
   0x6   :  { %s722_s11 = smov 0   ;;  %s724_s12 = smov 0  }
   0x7   :  { %s726_s13 = smov 0   ;;  %s728_s14 = smov 0  }
   0x8 LB: > { %s478_s15 = sadd.s32 4294967295, %s701_s14   ;;  %s479_s16 = sadd.s32 4294967294, %s701_s14   ;;  %s701_s14 = sphi %s728_s14, %s21_s14   ;;  %s697_s13 = sphi %s726_s13, %s869_s13   ;;  %s693_s12 = sphi %s724_s12, %s868_s12   ;;  %s689_s11 = sphi %s722_s11, %s867_s11   ;;  %s685_s10 = sphi %s720_s10, %s866_s10   ;;  %s681_s9 = sphi %s718_s9, %s865_s9  }
   0x9   : > { %s33_s17 = sadd.s32 1, %s697_s13  ;;  %s40_s18 = sadd.s32 1, %s689_s11 }
   0xa   : > { %p35_p0 = scmp.ge.s32.totalorder %s33_s17, 2  ;;  %p47_p1 = scmp.ne.s32.totalorder %s689_s11, %s685_s10 }
   0xb   : > { %p48_p2 = scmp.eq.s32.totalorder %s701_s14, 0  ;;  %p53_p3 = scmp.ne.s32.totalorder %s685_s10, %s681_s9 }
   0xc   : > { %s871_s17 = smov (%p35_p0, %s33_s17), 0  ;;  %p54_p5 = scmp.eq.s32.totalorder %s478_s15, 0 }
   0xd   : > { %p759_p4 = por %p48_p2, %p47_p1  ;;  %s37_s20 = ssub.s32 %s697_s13, %s871_s17 }
   0xe   : > { %p107_p6 = scmp.eq.s32.totalorder %s478_s15, 1  ;;  %p38_p7 = scmp.eq.s32.totalorder %s37_s20, 0 }
   0xf   : > { %p765_p8 = por %p54_p5, %p53_p3  ;;  %p113_p10 = scmp.eq.s32.totalorder %s479_s16, 1 }
  0x10   : > { %p769_p9 = por %p107_p6, %p47_p1  ;;  %p481_p12 = scmp.ge.s32.totalorder %s701_s14, 2 }
  0x11   : > { %s774_s23 = scalar_select %p38_p7, %s689_s11, %s40_s18  }
  0x12   : > { %p776_p11 = por %p113_p10, %p53_p3  ;;  %p505_p13 = scmp.lt.s32.totalorder %s701_s14, 2 }
  0x13   : > { %s133_s25 = sand.u32 1, %s689_s11   ;;  %s139_s28 = scalar_lea.hbm %s857_s0, %s697_s13 }
  0x14   : > { %s136_s29 = scalar_lea.vmem [#allocation2], %s133_s25  ;;  %s141_s3 = sshll.u32 %s139_s28, 4  ;;  %s142_s3 = int_to_ptr.hbm [resolvable:$true] %s141_s3 }
  0x15   : > { %s143_s30 = sshll.u32 %s136_s29, 4  ;;  %p789_p0 = pnand %p505_p13, %p759_p4  ;;  %s144_s30 = int_to_ptr.vmem [resolvable:$true] %s143_s30 }
  0x16   : > { %p484_p1 = scmp.ge.s32.totalorder %s701_s14, 1  ;;  %p168_p2 = scmp.lt.s32.totalorder %s701_s14, 3 }
  0x17   : > { %s134_s5 = scalar_lea.sflag [#allocation3], %s133_s25  ;;  %s482_s6 = sshll.u32 %s133_s25, 3 }
  0x18   : > { %497 = dma.hbm_to_vmem [thread:$0]  (!%p789_p0), %s142_s3, 16, %s144_s30, %s134_s5  }
  0x19   : > { %p169_p3 = pnand %p484_p1, %p168_p2  ;;  %s483_s7 = sshll.u32 %s697_s13, 3 }
  0x1a   : > { %s159_s16 = scalar_lea.hbm %s858_s1, %s483_s7  ;;  %s154_s18 = scalar_lea.vmem [#allocation5], %s482_s6 }
  0x1b   : > { %s163_s19 = sshll.u32 %s154_s18, 4  ;;  %s161_s20 = sshll.u32 %s159_s16, 4  ;;  %s164_s19 = int_to_ptr.vmem [resolvable:$true] %s163_s19  ;;  %s162_s20 = int_to_ptr.hbm [resolvable:$true] %s161_s20 }
  0x1c   : > { %s151_s26 = scalar_lea.sflag [#allocation6], %s133_s25  ;;  %172 = sbr.rel (%p169_p3) target bundleno = 191 (0xbf), region = 28 }
  0x1d   : > { %500 = dma.hbm_to_vmem [thread:$0]  (!%p789_p0), %s162_s20, 128, %s164_s19, %s151_s26  }
  0x1e   : > { %s804_s27 = sand.u32 (!%p169_p3), 1, %s685_s10  }
  0x1f   : > { %s175_s28 = scalar_lea.sflag (!%p169_p3), [#allocation3], %s804_s27  ;;  %s177_s29 = scalar_lea.vmem (!%p169_p3), [#allocation2], %s804_s27 }
  0x21   : > { %668 = dma.done.wait (%p765_p8), %s175_s28, 16  }
  0x22   : > { %670 = vsyncadd (%p765_p8), %s175_s28, 4294967280  ;;  %s485_s25 = sshll.u32 %s804_s27, 3  ;;  %s184_s30 = scalar_lea.sflag [#allocation6], %s804_s27 }
  0x23   : > { %s187_s3 = scalar_lea.vmem [#allocation5], %s485_s25 }
  0x24   : > { %672 = dma.done.wait (%p765_p8), %s184_s30, 128  }
  0x25   : > { %674 = vsyncadd (%p765_p8), %s184_s30, 4294967168  ;;  %vm214_vm0 = vcmask 261120   ;;  %v213_v0 = vld [vmem:[%s187_s3] sm:$0xff]  ;;  %v212_v1 = vld [vmem:[%s177_s29] sm:$0x1]  ;;  %s379_s5 = scalar_lea.hbm %s859_s2, %s693_s12  ;;  %s211_s6 = scalar_lea.vmem [#allocation7], %s804_s27 }
  0x26   : > { %v219_v2 = vsel %vm214_vm0, %v213_v0, 0  ;;  %v216_v3 = vsel %vm214_vm0, %v212_v1, 0  ;;  %s381_s7 = sshll.u32 %s211_s6, 4  ;;  %s383_s8 = sshll.u32 %s379_s5, 4  ;;  %vm367_vm1 = vcmask 57344   ;;  %s382_s7 = int_to_ptr.vmem [resolvable:$true] %s381_s7  ;;  %s384_s8 = int_to_ptr.hbm [resolvable:$true] %s383_s8 }
  0x27   : > { %v236_v4 = vand.u32 4294901760, %v219_v2  ;;  %v238_v5 = vand.u32 4294901760, %v216_v3  ;;  %s370_s15 = scalar_lea.sflag [#allocation4], %s804_s27  ;;  %s629_s16 = sshra.s32 %s384_s8, 4  ;;  %s630_s16 = int_to_ptr.hbm [resolvable:$true] %s629_s16 }
  0x28   : > { %s631_s18 = scalar_lea.hbm %s630_s16, 1  ;;  %s635_s20 = scalar_lea.hbm %s859_s2, 2 }
  0x29   : > { %v263_v6 = vsub.f32 %v219_v2, %v236_v4  ;;  %237 = vmatpush.xpose.msra.mxu0 %v236_v4  ;;  %313 = vmatpush.xpose.msra.mxu3 %v236_v4  ;;  %v239_v7 = vsub.f32 %v216_v3, %v238_v5  ;;  %p632_p4 = scmp.ne.s32.totalorder %s630_s16, %s631_s18  ;;  %p636_p7 = scmp.lt.s32.totalorder %s630_s16, %s859_s2 }
  0x2a   : > { %p637_p8 = scmp.lt.s32.totalorder %s635_s20, %s631_s18 }
  0x2b   : > { %290 = vmatpush.xpose.msra.mxu2 %v263_v6  ;;  %v264_v8 = vand.u32 4294901760, %v263_v6  ;;  %v240_v9 = vand.u32 4294901760, %v239_v7  ;;  %p633_p5 = pnand %p632_p4, %p769_p9 }
  0x2c   : > { %p638_p10 = por %p637_p8, %p636_p7 }
  0x2d   : > { %v265_v10 = vsub.f32 %v263_v6, %v264_v8  ;;  %v241_v11 = vsub.f32 %v239_v7, %v240_v9  ;;  %317 = vmatmul.f32.vlgmr.msra.gmra.mxu3 %v240_v9  ;;  %339 = vmatpush.xpose.msrb.mxu0 %v264_v8  ;;  %p634_p6 = pneg %p633_p5 }
  0x2e   : > { %293 = vmatmul.f32.vlgmr.msra.gmra.mxu2 %v239_v7 }
  0x2f   : > { %v266_v12 = vand.u32 4294901760, %v265_v10  ;;  %v242_v13 = vand.u32 4294901760, %v241_v11  ;;  %p639_p13 = pnand %p638_p10, %p634_p6 }
  0x31   : > { %267 = vmatpush.xpose.msra.mxu1 %v266_v12  ;;  %243 = vmatmul.f32.vlgmr.msra.gmra.mxu0 %v242_v13 }
  0x34   : > { %269 = vmatmul.f32.vlgmr.msra.gmra.mxu1 %v238_v5 }
  0x35   : > { %361 = vmatpush.xpose.msrb.mxu1 %v236_v4 }
  0x39   : > { %341 = vmatmul.f32.vlgmr.msrb.gmra.mxu0 %v238_v5 }
  0x3c   : > { %363 = vmatmul.f32.vlgmr.msrb.gmra.mxu1 %v238_v5 }
  0xae   : > { %v244_v14 = vpop.f32.mrf.mxu0 }
  0xb0   : > { %v318_v18 = vpop.f32.mrf.mxu3 }
  0xb1   : > { %v270_v15 = vpop.f32.mrf.mxu1  ;;  %v294_v16 = vpop.f32.mrf.mxu2 }
  0xb2   : > { %v271_v17 = vadd.f32 %v270_v15, %v244_v14 }
  0xb4   : > { %v295_v19 = vadd.f32 %v294_v16, %v271_v17 }
  0xb6   : > { %v319_v20 = vadd.f32 %v318_v18, %v295_v19  ;;  %v342_v21 = vpop.f32.mrf.mxu0 }
  0xb8   : > { %v343_v22 = vadd.f32 %v342_v21, %v319_v20 }
  0xb9   : > { %v364_v23 = vpop.f32.mrf.mxu1 }
  0xba   : > { %v365_v24 = vadd.f32 %v364_v23, %v343_v22 }
  0xbc   : > { %368 = vst.msk [vmem:[%s211_s6] sm:$0x1] %vm367_vm1, %v365_v24 }
  0xbd   : > { %642 = shalt.err (!%p639_p13)
}
  0xbe   : > { %492 = dma.vmem_to_hbm [thread:$0]  (%p769_p9), %s382_s7, 16, %s384_s8, %s370_s15  }
  0xbf PF: > { %s395_s27 = sand.u32 1, %s681_s9   ;;  %p502_p0 = pnand %p481_p12, %p776_p11 }
  0xc0   : > { %s396_s29 = scalar_lea.sflag [#allocation4], %s395_s27 }
  0xc1   : > { %p503_p1 = pneg %p502_p0 }
  0xc3   : > { %676 = dma.done.wait (%p503_p1), %s396_s29, 16  }
  0xc4   : > { %678 = vsyncadd (%p503_p1), %s396_s29, 4294967280  ;;  %s21_s14 = sadd.s32 1, %s701_s14   ;;  %s865_s9 = smov %s685_s10 }
  0xc5   : > { %p18_p2 = scmp.ge.s32.totalorder %s21_s14, 4   ;;  %s866_s10 = smov %s689_s11 }
  0xc6   : > { %s867_s11 = smov %s774_s23  ;;  %s868_s12 = smov %s697_s13 }
  0xc7   : > { %s869_s13 = smov %s871_s17  ;;  %20 = sbr.rel (!%p18_p2) target bundleno = 8 (0x8), region = 86 }
  0xcc   :  { %401 = vsyncpa [#allocation3], 1 }
  0xcd   :  { %403 = vsyncpa [#allocation3 + $0x1], 1 }
  0xce   :  { %404 = vsyncpa [#allocation6], 1 }
  0xcf   :  { %406 = vsyncpa [#allocation6 + $0x1], 1 }
  0xd0   :  { %407 = vsyncpa [#allocation4], 1 }
  0xd1   :  { %409 = vsyncpa [#allocation4 + $0x1], 1 }

</bundles_post_ra>
